<compile_context>
chip_gen: v5e
topology: v5e:2x2
jax: 0.10.0
libtpu: 0.0.40
codegen_flags: <defaults>
</compile_context>

<pallas_src>
import jax
import jax.numpy as jnp
from jax.experimental import pallas as pl
from jax.experimental.pallas import tpu as pltpu


# ----------------------------- Pallas kernel -----------------------------
def _san_kernel(meta_ref,                      # SMEM (n, 4) int32: [has_u, has_d, u_slot, d_slot]
                x_ref, L_ref, lu_hbm, ld_hbm, wcat_ref,
                out_ref,
                adj_u, adj_d, sems, acc_ref):
    d = pl.program_id(0)
    Dp = out_ref.shape[1]                      # 128-lane padded output feature size
    has_u = meta_ref[d, 0] == 1
    has_d = meta_ref[d, 1] == 1

    # Start the gated adjacency DMAs first so they overlap with the matmuls below.
    # When a Laplacian is None neither HBM bandwidth nor the VMEM buffer is touched.
    @pl.when(has_u)
    def _():
        pltpu.make_async_copy(lu_hbm.at[meta_ref[d, 2]], adj_u, sems.at[0]).start()

    @pl.when(has_d)
    def _():
        pltpu.make_async_copy(ld_hbm.at[meta_ref[d, 3]], adj_d, sems.at[1]).start()

    x = x_ref[...]                                                      # (Np, Din)
    # One lane-dense fused matmul over [ws | wp | wu | wd | wu@au1, wu@au2, wd@ad1, wd@ad2, 0..]
    F = jnp.dot(x, wcat_ref[...], preferred_element_type=jnp.float32)   # (Np, 4*Dp + 128)
    fs = F[:, 0 * Dp:1 * Dp]
    fp = F[:, 1 * Dp:2 * Dp]
    fu = F[:, 2 * Dp:3 * Dp]
    fd = F[:, 3 * Dp:4 * Dp]
    sc = F[:, 4 * Dp:]                          # folded GAT attention score columns

    acc_ref[...] = jnp.tanh(fs) + jnp.tanh(     # h_s + h_p
        jnp.dot(L_ref[...], fp, preferred_element_type=jnp.float32))

    def gat(adj, f, c1, c2):
        scores = c1 + c2.T                                              # a_1 + a_2.T  (Np, Np)
        scores = jnp.where(scores >= 0.0, scores, 0.01 * scores)        # LeakyReLU(0.01)
        mask = adj != 0                                                 # int8 0/1 adjacency
        masked = jnp.where(mask, scores, jnp.float32(-1e30))
        rmax = jnp.max(masked, axis=1, keepdims=True)
        # exp sees either (finite - finite row max) or ~-1e30 (underflows to 0):
        # never generates inf, rows with no edges stay exactly zero.
        e = jnp.where(mask, jnp.exp(masked - rmax), 0.0)
        denom = jnp.sum(e, axis=1, keepdims=True)
        safe = jnp.where(denom > 0.0, denom, 1.0)
        inv = pl.reciprocal(safe, approx=True)
        inv = inv * (2.0 - safe * inv)          # one Newton step -> ~fp32 accurate, EUP-slot divide
        attn = e * inv                          # sparse.softmax(dim=1)
        return jnp.tanh(jnp.dot(attn, f, preferred_element_type=jnp.float32))

    @pl.when(has_u)
    def _():
        pltpu.make_async_copy(lu_hbm.at[meta_ref[d, 2]], adj_u, sems.at[0]).wait()
        acc_ref[...] += gat(adj_u[...], fu, sc[:, 0:1], sc[:, 1:2])

    @pl.when(has_d)
    def _():
        pltpu.make_async_copy(ld_hbm.at[meta_ref[d, 3]], adj_d, sems.at[1]).wait()
        acc_ref[...] += gat(adj_d[...], fd, sc[:, 2:3], sc[:, 3:4])

    # Single lane-dense store.
    out_ref[...] = acc_ref[...]


def _san_batched(meta, Xs, Ls, Lu_stack, Ld_stack, Wcat, D_pad):
    n, N_pad, Din = Xs.shape
    Wtot = Wcat.shape[2]

    def spec(trailing):
        # Leading dim squeezed (one simplex dimension per grid step); index_map
        # receives (grid_idx, *scalar_prefetch_refs).
        return pl.BlockSpec((None,) + tuple(trailing), lambda i, meta_ref: (i, 0, 0))

    return pl.pallas_call(
        _san_kernel,
        out_shape=jax.ShapeDtypeStruct((n, N_pad, D_pad), jnp.float32),
        grid_spec=pltpu.PrefetchScalarGridSpec(
            num_scalar_prefetch=1,
            grid=(n,),
            in_specs=[
                spec((N_pad, Din)),                    # X
                spec((N_pad, N_pad)),                  # L (fp32 values, auto-pipelined)
                pl.BlockSpec(memory_space=pl.ANY),     # compacted L_u stack (int8 HBM, manual DMA)
                pl.BlockSpec(memory_space=pl.ANY),     # compacted L_d stack (int8 HBM, manual DMA)
                spec((Din, Wtot)),                     # fused per-dim weights
            ],
            out_specs=spec((N_pad, D_pad)),
            scratch_shapes=[
                pltpu.VMEM((N_pad, N_pad), jnp.int8),      # adj_u landing buffer
                pltpu.VMEM((N_pad, N_pad), jnp.int8),      # adj_d landing buffer
                pltpu.SemaphoreType.DMA((2,)),
                pltpu.VMEM((N_pad, D_pad), jnp.float32),   # accumulator (single final store)
            ],
        ),
        compiler_params=pltpu.CompilerParams(
            dimension_semantics=("parallel",)),        # dims independent -> 2 TCs on v7x
    )(meta, Xs, Ls, Lu_stack, Ld_stack, Wcat)


# ------------------------------ host wrapper ------------------------------
def san_layer_forward(X, L, L_u, L_d, dimensions, params):
    active = [i for i in range(dimensions) if X[i] is not None]
    if not active:
        return []
    Din = X[active[0]].shape[1]
    Dout = params[active[0]]["ws"].shape[1]
    Ns = [X[i].shape[0] for i in active]
    N_pad = max(32, -(-max(Ns) // 32) * 32)    # multiple of 32 (int8 sublane tile)
    D_pad = -(-Dout // 128) * 128              # 128-lane-dense output / weight chunks

    def padf(a, rows, cols):
        a = a.astype(jnp.float32)
        return jnp.pad(a, ((0, rows - a.shape[0]), (0, cols - a.shape[1])))

    def pad_adj(a):
        # exact match of np.where(adj == 1) semantics; int8 -> 4x less DMA than fp32
        m = (a == 1.0).astype(jnp.int8)
        return jnp.pad(m, ((0, N_pad - m.shape[0]), (0, N_pad - m.shape[1])))

    def build_wcat(p):
        def padw(w):
            return jnp.pad(w.astype(jnp.float32), ((0, 0), (0, D_pad - Dout)))
        # Fold the attention vectors into the projection: (X@Wu)@a == X@(Wu@a).
        sc = jnp.concatenate([p["wu"] @ p["au1"], p["wu"] @ p["au2"],
                              p["wd"] @ p["ad1"], p["wd"] @ p["ad2"]], axis=1)
        sc = jnp.pad(sc.astype(jnp.float32), ((0, 0), (0, 128 - sc.shape[1])))
        return jnp.concatenate(
            [padw(p["ws"]), padw(p["wp"]), padw(p["wu"]), padw(p["wd"]), sc], axis=1)

    xs, ls, wcats, meta, lus, lds = [], [], [], [], [], []
    for i in active:
        p = params[i]
        xs.append(padf(X[i], N_pad, Din))
        ls.append(padf(L[i], N_pad, N_pad))
        wcats.append(build_wcat(p))
        u_slot = d_slot = 0
        if L_u[i] is not None:
            u_slot = len(lus)
            lus.append(pad_adj(L_u[i]))
        if L_d[i] is not None:
            d_slot = len(lds)
            lds.append(pad_adj(L_d[i]))
        meta.append((int(L_u[i] is not None), int(L_d[i] is not None), u_slot, d_slot))

    dummy = jnp.zeros((1, N_pad, N_pad), jnp.int8)   # never DMA'd (flag == 0 everywhere)
    Lu_stack = jnp.stack(lus) if lus else dummy
    Ld_stack = jnp.stack(lds) if lds else dummy

    out = _san_batched(
        jnp.asarray(meta, jnp.int32),
        jnp.stack(xs), jnp.stack(ls), Lu_stack, Ld_stack, jnp.stack(wcats), D_pad)
    return [out[k, :Ns[k], :Dout] for k in range(len(active))]


# ----------------------- pure-JAX reference (for checking) -----------------------
def _gat_ref(x, adj, w, a1, a2):
    f = x @ w
    scores = (f @ a1) + (f @ a2).T
    scores = jnp.where(scores >= 0.0, scores, 0.01 * scores)
    mask = adj == 1.0
    masked = jnp.where(mask, scores, jnp.float32(-1e30))
    rmax = jnp.max(masked, axis=1, keepdims=True)
    e = jnp.where(mask, jnp.exp(masked - rmax), 0.0)
    denom = jnp.sum(e, axis=1, keepdims=True)
    attn = e / jnp.where(denom > 0.0, denom, 1.0)
    return attn @ f


def _san_dim_ref(x, L, L_u, L_d, p):
    hp = jnp.tanh(L @ (x @ p["wp"]))
    hs = jnp.tanh(x @ p["ws"])
    hu = (jnp.tanh(_gat_ref(x, L_u, p["wu"], p["au1"], p["au2"]))
          if L_u is not None else jnp.zeros_like(hp))
    hd = (jnp.tanh(_gat_ref(x, L_d, p["wd"], p["ad1"], p["ad2"]))
          if L_d is not None else jnp.zeros_like(hp))
    return hs + hu + hd + hp


# ----------------------------- parameter init -----------------------------
def init_params(key, input_size, output_size):
    ks = jax.random.split(key, 8)
    sc = 0.1
    n = lambda k, s: (jax.random.normal(k, s, jnp.float32) * sc)
    return dict(
        wp=n(ks[0], (input_size, output_size)),   # p_layers[i].weight.T
        ws=n(ks[1], (input_size, output_size)),   # s_layers[i].weight.T
        wu=n(ks[2], (input_size, output_size)),   # l_u_layers[i].layer.weight.T
        au1=n(ks[3], (output_size, 1)),           # l_u_layers[i].a_1.weight.T
        au2=n(ks[4], (output_size, 1)),           # l_u_layers[i].a_2.weight.T
        wd=n(ks[5], (input_size, output_size)),   # l_d_layers[i].layer.weight.T
        ad1=n(ks[6], (output_size, 1)),           # l_d_layers[i].a_1.weight.T
        ad2=n(ks[7], (output_size, 1)),           # l_d_layers[i].a_2.weight.T
    )


if __name__ == "__main__":
    input_size, output_size = 16, 32
    dimensions = 2
    Ns = [12, 20]                       # number of simplices per dimension

    key = jax.random.PRNGKey(0)
    kX, kL, kA, kP = jax.random.split(key, 4)

    X, L, L_u, L_d, params = [], [], [], [], []
    for i in range(dimensions):
        N = Ns[i]
        kx, kl, ku, kd = jax.random.split(jax.random.fold_in(kX, i), 4)
        X.append(jax.random.normal(kx, (N, input_size), jnp.float32))
        L.append(jax.random.normal(kl, (N, N), jnp.float32) * 0.2)   # dense stand-in for sparse L
        adj_u = (jax.random.uniform(ku, (N, N)) > 0.6).astype(jnp.float32)
        adj_d = (jax.random.uniform(kd, (N, N)) > 0.6).astype(jnp.float32)
        L_u.append(adj_u)
        L_d.append(adj_d if i == 0 else None)     # exercise the flag==0 (no-DMA / skip-GAT) path
        params.append(init_params(jax.random.fold_in(kP, i), input_size, output_size))

    outs = san_layer_forward(X, L, L_u, L_d, dimensions, params)
    outs = [jax.block_until_ready(o) for o in outs]

    refs = [_san_dim_ref(X[i], L[i], L_u[i], L_d[i], params[i]) for i in range(dimensions)]
    for o, r in zip(outs, refs):
        assert o.shape == r.shape
        err = float(jnp.max(jnp.abs(o - r)))
        assert jnp.allclose(o, r, rtol=1e-4, atol=1e-4), err

    print("KERNEL_OK")
</pallas_src>

<mosaic_0001>
module attributes {stable_mosaic.version = 11 : i64} {
  func.func @_san_kernel(%arg0: i32, %arg1: memref<2x4xi32, #tpu.memory_space<smem>>, %arg2: memref<1x32x16xf32, #tpu.memory_space<vmem>>, %arg3: memref<1x32x32xf32, #tpu.memory_space<vmem>>, %arg4: memref<2x32x32xi8, #tpu.memory_space<any>>, %arg5: memref<1x32x32xi8, #tpu.memory_space<any>>, %arg6: memref<1x16x640xf32, #tpu.memory_space<vmem>>, %arg7: memref<1x32x128xf32, #tpu.memory_space<vmem>>, %arg8: memref<32x32xi8, #tpu.memory_space<vmem>>, %arg9: memref<32x32xi8, #tpu.memory_space<vmem>>, %arg10: memref<2x!tpu.dma_semaphore, #tpu.memory_space<semaphore_mem>>, %arg11: memref<32x128xf32, #tpu.memory_space<vmem>>) attributes {dimension_semantics = [#tpu.dimension_semantics<parallel>], iteration_bounds = array<i64: 2>, scalar_prefetch = 1 : i64, scratch_operands = 4 : i64, tpu.core_type = #tpu.core_type<tc>, window_params = [{transform_indices = @transform_0, window_bounds = array<i64: 1, 32, 16>}, {transform_indices = @transform_1, window_bounds = array<i64: 1, 32, 32>}, {}, {}, {transform_indices = @transform_4, window_bounds = array<i64: 1, 16, 640>}, {transform_indices = @transform_5, window_bounds = array<i64: 1, 32, 128>}]} {
    %0 = arith.index_cast %arg0 : i32 to index
    %c0 = arith.constant 0 : index
    %1 = memref.load %arg1[%0, %c0] : memref<2x4xi32, #tpu.memory_space<smem>>
    %c1_i32 = arith.constant 1 : i32
    %2 = arith.cmpi eq, %1, %c1_i32 : i32
    %3 = arith.index_cast %arg0 : i32 to index
    %c1 = arith.constant 1 : index
    %4 = memref.load %arg1[%3, %c1] : memref<2x4xi32, #tpu.memory_space<smem>>
    %c1_i32_0 = arith.constant 1 : i32
    %5 = arith.cmpi eq, %4, %c1_i32_0 : i32
    %6 = arith.extui %2 : i1 to i32
    %c0_i32 = arith.constant 0 : i32
    %7 = arith.cmpi ne, %6, %c0_i32 : i32
    scf.if %7 {
      %35 = arith.index_cast %arg0 : i32 to index
      %c2 = arith.constant 2 : index
      %36 = memref.load %arg1[%35, %c2] : memref<2x4xi32, #tpu.memory_space<smem>>
      %c0_i32_21 = arith.constant 0 : i32
      %c0_i32_22 = arith.constant 0 : i32
      %c0_i32_23 = arith.constant 0 : i32
      %37 = tpu.memref_slice %arg4[%36, %c0_i32_22, %c0_i32_23] : memref<2x32x32xi8, #tpu.memory_space<any>> -> memref<1x32x32xi8, #tpu.memory_space<any>>
      %38 = tpu.memref_squeeze %37 : memref<1x32x32xi8, #tpu.memory_space<any>> -> memref<32x32xi8, #tpu.memory_space<any>>
      %39 = tpu.memref_slice %arg10[%c0_i32_21] : memref<2x!tpu.dma_semaphore, #tpu.memory_space<semaphore_mem>> -> memref<1x!tpu.dma_semaphore, #tpu.memory_space<semaphore_mem>>
      %40 = tpu.memref_squeeze %39 : memref<1x!tpu.dma_semaphore, #tpu.memory_space<semaphore_mem>> -> memref<!tpu.dma_semaphore, #tpu.memory_space<semaphore_mem>>
      tpu.enqueue_dma source(%38 : memref<32x32xi8, #tpu.memory_space<any>>) target(%arg8 : memref<32x32xi8, #tpu.memory_space<vmem>>) target_semaphore(%40 : memref<!tpu.dma_semaphore, #tpu.memory_space<semaphore_mem>>)
    } else {
    }
    %8 = arith.extui %5 : i1 to i32
    %c0_i32_1 = arith.constant 0 : i32
    %9 = arith.cmpi ne, %8, %c0_i32_1 : i32
    scf.if %9 {
      %35 = arith.index_cast %arg0 : i32 to index
      %c3 = arith.constant 3 : index
      %36 = memref.load %arg1[%35, %c3] : memref<2x4xi32, #tpu.memory_space<smem>>
      %c1_i32_21 = arith.constant 1 : i32
      %c0_i32_22 = arith.constant 0 : i32
      %c0_i32_23 = arith.constant 0 : i32
      %37 = tpu.memref_slice %arg5[%36, %c0_i32_22, %c0_i32_23] : memref<1x32x32xi8, #tpu.memory_space<any>> -> memref<1x32x32xi8, #tpu.memory_space<any>>
      %38 = tpu.memref_squeeze %37 : memref<1x32x32xi8, #tpu.memory_space<any>> -> memref<32x32xi8, #tpu.memory_space<any>>
      %39 = tpu.memref_slice %arg10[%c1_i32_21] : memref<2x!tpu.dma_semaphore, #tpu.memory_space<semaphore_mem>> -> memref<1x!tpu.dma_semaphore, #tpu.memory_space<semaphore_mem>>
      %40 = tpu.memref_squeeze %39 : memref<1x!tpu.dma_semaphore, #tpu.memory_space<semaphore_mem>> -> memref<!tpu.dma_semaphore, #tpu.memory_space<semaphore_mem>>
      tpu.enqueue_dma source(%38 : memref<32x32xi8, #tpu.memory_space<any>>) target(%arg9 : memref<32x32xi8, #tpu.memory_space<vmem>>) target_semaphore(%40 : memref<!tpu.dma_semaphore, #tpu.memory_space<semaphore_mem>>)
    } else {
    }
    %c0_2 = arith.constant 0 : index
    %c0_3 = arith.constant 0 : index
    %c0_4 = arith.constant 0 : index
    %10 = vector.load %arg2[%c0_2, %c0_3, %c0_4] : memref<1x32x16xf32, #tpu.memory_space<vmem>>, vector<1x32x16xf32>
    %11 = vector.shape_cast %10 : vector<1x32x16xf32> to vector<32x16xf32>
    %c0_5 = arith.constant 0 : index
    %c0_6 = arith.constant 0 : index
    %c0_7 = arith.constant 0 : index
    %12 = vector.load %arg6[%c0_5, %c0_6, %c0_7] : memref<1x16x640xf32, #tpu.memory_space<vmem>>, vector<1x16x640xf32>
    %13 = vector.shape_cast %12 : vector<1x16x640xf32> to vector<16x640xf32>
    %cst = arith.constant dense<0.000000e+00> : vector<32x640xf32>
    %14 = tpu.matmul %11, %13, %cst {dimension_numbers = #tpu.dot_dimension_numbers<[1], [0], [0], [1], [0, 0, 1, 1], [], []>} : vector<32x16xf32>, vector<16x640xf32>, vector<32x640xf32> -> vector<32x640xf32>
    %15 = vector.extract_strided_slice %14 {offsets = [0, 0], sizes = [32, 128], strides = [1, 1]} : vector<32x640xf32> to vector<32x128xf32>
    %16 = vector.extract_strided_slice %14 {offsets = [0, 128], sizes = [32, 128], strides = [1, 1]} : vector<32x640xf32> to vector<32x128xf32>
    %17 = vector.extract_strided_slice %14 {offsets = [0, 256], sizes = [32, 128], strides = [1, 1]} : vector<32x640xf32> to vector<32x128xf32>
    %18 = vector.extract_strided_slice %14 {offsets = [0, 384], sizes = [32, 128], strides = [1, 1]} : vector<32x640xf32> to vector<32x128xf32>
    %19 = vector.extract_strided_slice %14 {offsets = [0, 512], sizes = [32, 128], strides = [1, 1]} : vector<32x640xf32> to vector<32x128xf32>
    %20 = math.tanh %15 : vector<32x128xf32>
    %c0_8 = arith.constant 0 : index
    %c0_9 = arith.constant 0 : index
    %c0_10 = arith.constant 0 : index
    %21 = vector.load %arg3[%c0_8, %c0_9, %c0_10] : memref<1x32x32xf32, #tpu.memory_space<vmem>>, vector<1x32x32xf32>
    %22 = vector.shape_cast %21 : vector<1x32x32xf32> to vector<32x32xf32>
    %cst_11 = arith.constant dense<0.000000e+00> : vector<32x128xf32>
    %23 = tpu.matmul %22, %16, %cst_11 {dimension_numbers = #tpu.dot_dimension_numbers<[1], [0], [0], [1], [0, 0, 1, 1], [], []>} : vector<32x32xf32>, vector<32x128xf32>, vector<32x128xf32> -> vector<32x128xf32>
    %24 = math.tanh %23 : vector<32x128xf32>
    %25 = arith.addf %20, %24 : vector<32x128xf32>
    %c0_12 = arith.constant 0 : index
    %c0_13 = arith.constant 0 : index
    %26 = vector.load %arg11[%c0_12, %c0_13] : memref<32x128xf32, #tpu.memory_space<vmem>>, vector<32x128xf32>
    tpu.vector_store %arg11[%c0_12, %c0_13], %25 {strides = array<i32>} : memref<32x128xf32, #tpu.memory_space<vmem>>, vector<32x128xf32>,
    %27 = arith.extui %2 : i1 to i32
    %c0_i32_14 = arith.constant 0 : i32
    %28 = arith.cmpi ne, %27, %c0_i32_14 : i32
    scf.if %28 {
      %35 = arith.index_cast %arg0 : i32 to index
      %c2 = arith.constant 2 : index
      %36 = memref.load %arg1[%35, %c2] : memref<2x4xi32, #tpu.memory_space<smem>>
      %c0_i32_21 = arith.constant 0 : i32
      %c0_i32_22 = arith.constant 0 : i32
      %c0_i32_23 = arith.constant 0 : i32
      %37 = tpu.memref_slice %arg4[%36, %c0_i32_22, %c0_i32_23] : memref<2x32x32xi8, #tpu.memory_space<any>> -> memref<1x32x32xi8, #tpu.memory_space<any>>
      %38 = tpu.memref_squeeze %37 : memref<1x32x32xi8, #tpu.memory_space<any>> -> memref<32x32xi8, #tpu.memory_space<any>>
      %39 = tpu.memref_slice %arg10[%c0_i32_21] : memref<2x!tpu.dma_semaphore, #tpu.memory_space<semaphore_mem>> -> memref<1x!tpu.dma_semaphore, #tpu.memory_space<semaphore_mem>>
      %40 = tpu.memref_squeeze %39 : memref<1x!tpu.dma_semaphore, #tpu.memory_space<semaphore_mem>> -> memref<!tpu.dma_semaphore, #tpu.memory_space<semaphore_mem>>
      tpu.wait_dma2 semaphore(%40 : memref<!tpu.dma_semaphore, #tpu.memory_space<semaphore_mem>>) src(%38 : memref<32x32xi8, #tpu.memory_space<any>>) dst(%arg8 : memref<32x32xi8, #tpu.memory_space<vmem>>)
      %c0_24 = arith.constant 0 : index
      %c0_25 = arith.constant 0 : index
      %41 = vector.load %arg11[%c0_24, %c0_25] : memref<32x128xf32, #tpu.memory_space<vmem>>, vector<32x128xf32>
      %c0_26 = arith.constant 0 : index
      %c0_27 = arith.constant 0 : index
      %42 = vector.load %arg8[%c0_26, %c0_27] : memref<32x32xi8, #tpu.memory_space<vmem>>, vector<32x32xi8>
      %43 = vector.extract_strided_slice %19 {offsets = [0, 0], sizes = [32, 1], strides = [1, 1]} : vector<32x128xf32> to vector<32x1xf32>
      %44 = vector.extract_strided_slice %19 {offsets = [0, 1], sizes = [32, 1], strides = [1, 1]} : vector<32x128xf32> to vector<32x1xf32>
      %45 = tpu.transpose %44, [1, 0] : vector<32x1xf32> -> vector<1x32xf32>
      %46 = vector.broadcast %43 : vector<32x1xf32> to vector<32x32xf32>
      %47 = vector.broadcast %45 : vector<1x32xf32> to vector<32x32xf32>
      %48 = arith.addf %46, %47 : vector<32x32xf32>
      %cst_28 = arith.constant 0.000000e+00 : f32
      %49 = vector.broadcast %cst_28 : f32 to vector<32x32xf32>
      %50 = arith.cmpf oge, %48, %49 : vector<32x32xf32>
      %cst_29 = arith.constant 0.00999999977 : f32
      %51 = vector.broadcast %cst_29 : f32 to vector<32x32xf32>
      %52 = arith.mulf %51, %48 : vector<32x32xf32>
      %53 = arith.select %50, %48, %52 : vector<32x32xi1>, vector<32x32xf32>
      %c0_i8 = arith.constant 0 : i8
      %54 = vector.broadcast %c0_i8 : i8 to vector<32x32xi8>
      %55 = arith.cmpi ne, %42, %54 : vector<32x32xi8>
      %cst_30 = arith.constant -1.000000e+30 : f32
      %56 = vector.broadcast %cst_30 : f32 to vector<32x32xf32>
      %57 = arith.select %55, %53, %56 : vector<32x32xi1>, vector<32x32xf32>
      %cst_31 = arith.constant dense<0xFF800000> : vector<32xf32>
      %58 = vector.multi_reduction <maximumf>, %57, %cst_31 [1] : vector<32x32xf32> to vector<32xf32>
      %59 = vector.shape_cast %58 : vector<32xf32> to vector<32x1xf32>
      %60 = vector.broadcast %59 : vector<32x1xf32> to vector<32x32xf32>
      %61 = arith.subf %57, %60 : vector<32x32xf32>
      %62 = math.exp %61 : vector<32x32xf32>
      %cst_32 = arith.constant 0.000000e+00 : f32
      %63 = vector.broadcast %cst_32 : f32 to vector<32x32xf32>
      %64 = arith.select %55, %62, %63 : vector<32x32xi1>, vector<32x32xf32>
      %cst_33 = arith.constant dense<0.000000e+00> : vector<32xf32>
      %65 = vector.multi_reduction <add>, %64, %cst_33 [1] : vector<32x32xf32> to vector<32xf32>
      %66 = vector.shape_cast %65 : vector<32xf32> to vector<32x1xf32>
      %cst_34 = arith.constant 0.000000e+00 : f32
      %67 = vector.broadcast %cst_34 : f32 to vector<32x1xf32>
      %68 = arith.cmpf ogt, %66, %67 : vector<32x1xf32>
      %cst_35 = arith.constant 1.000000e+00 : f32
      %69 = vector.broadcast %cst_35 : f32 to vector<32x1xf32>
      %70 = arith.select %68, %66, %69 : vector<32x1xi1>, vector<32x1xf32>
      %71 = tpu.reciprocal %70 {approx = true} : vector<32x1xf32> -> vector<32x1xf32>
      %72 = arith.mulf %70, %71 : vector<32x1xf32>
      %cst_36 = arith.constant 2.000000e+00 : f32
      %73 = vector.broadcast %cst_36 : f32 to vector<32x1xf32>
      %74 = arith.subf %73, %72 : vector<32x1xf32>
      %75 = arith.mulf %71, %74 : vector<32x1xf32>
      %76 = vector.broadcast %75 : vector<32x1xf32> to vector<32x32xf32>
      %77 = arith.mulf %64, %76 : vector<32x32xf32>
      %cst_37 = arith.constant dense<0.000000e+00> : vector<32x128xf32>
      %78 = tpu.matmul %77, %17, %cst_37 {dimension_numbers = #tpu.dot_dimension_numbers<[1], [0], [0], [1], [0, 0, 1, 1], [], []>} : vector<32x32xf32>, vector<32x128xf32>, vector<32x128xf32> -> vector<32x128xf32>
      %79 = math.tanh %78 : vector<32x128xf32>
      %80 = arith.addf %41, %79 : vector<32x128xf32>
      %c0_38 = arith.constant 0 : index
      %c0_39 = arith.constant 0 : index
      %81 = vector.load %arg11[%c0_38, %c0_39] : memref<32x128xf32, #tpu.memory_space<vmem>>, vector<32x128xf32>
      tpu.vector_store %arg11[%c0_38, %c0_39], %80 {strides = array<i32>} : memref<32x128xf32, #tpu.memory_space<vmem>>, vector<32x128xf32>,
    } else {
    }
    %29 = arith.extui %5 : i1 to i32
    %c0_i32_15 = arith.constant 0 : i32
    %30 = arith.cmpi ne, %29, %c0_i32_15 : i32
    scf.if %30 {
      %35 = arith.index_cast %arg0 : i32 to index
      %c3 = arith.constant 3 : index
      %36 = memref.load %arg1[%35, %c3] : memref<2x4xi32, #tpu.memory_space<smem>>
      %c1_i32_21 = arith.constant 1 : i32
      %c0_i32_22 = arith.constant 0 : i32
      %c0_i32_23 = arith.constant 0 : i32
      %37 = tpu.memref_slice %arg5[%36, %c0_i32_22, %c0_i32_23] : memref<1x32x32xi8, #tpu.memory_space<any>> -> memref<1x32x32xi8, #tpu.memory_space<any>>
      %38 = tpu.memref_squeeze %37 : memref<1x32x32xi8, #tpu.memory_space<any>> -> memref<32x32xi8, #tpu.memory_space<any>>
      %39 = tpu.memref_slice %arg10[%c1_i32_21] : memref<2x!tpu.dma_semaphore, #tpu.memory_space<semaphore_mem>> -> memref<1x!tpu.dma_semaphore, #tpu.memory_space<semaphore_mem>>
      %40 = tpu.memref_squeeze %39 : memref<1x!tpu.dma_semaphore, #tpu.memory_space<semaphore_mem>> -> memref<!tpu.dma_semaphore, #tpu.memory_space<semaphore_mem>>
      tpu.wait_dma2 semaphore(%40 : memref<!tpu.dma_semaphore, #tpu.memory_space<semaphore_mem>>) src(%38 : memref<32x32xi8, #tpu.memory_space<any>>) dst(%arg9 : memref<32x32xi8, #tpu.memory_space<vmem>>)
      %c0_24 = arith.constant 0 : index
      %c0_25 = arith.constant 0 : index
      %41 = vector.load %arg11[%c0_24, %c0_25] : memref<32x128xf32, #tpu.memory_space<vmem>>, vector<32x128xf32>
      %c0_26 = arith.constant 0 : index
      %c0_27 = arith.constant 0 : index
      %42 = vector.load %arg9[%c0_26, %c0_27] : memref<32x32xi8, #tpu.memory_space<vmem>>, vector<32x32xi8>
      %43 = vector.extract_strided_slice %19 {offsets = [0, 2], sizes = [32, 1], strides = [1, 1]} : vector<32x128xf32> to vector<32x1xf32>
      %44 = vector.extract_strided_slice %19 {offsets = [0, 3], sizes = [32, 1], strides = [1, 1]} : vector<32x128xf32> to vector<32x1xf32>
      %45 = tpu.transpose %44, [1, 0] : vector<32x1xf32> -> vector<1x32xf32>
      %46 = vector.broadcast %43 : vector<32x1xf32> to vector<32x32xf32>
      %47 = vector.broadcast %45 : vector<1x32xf32> to vector<32x32xf32>
      %48 = arith.addf %46, %47 : vector<32x32xf32>
      %cst_28 = arith.constant 0.000000e+00 : f32
      %49 = vector.broadcast %cst_28 : f32 to vector<32x32xf32>
      %50 = arith.cmpf oge, %48, %49 : vector<32x32xf32>
      %cst_29 = arith.constant 0.00999999977 : f32
      %51 = vector.broadcast %cst_29 : f32 to vector<32x32xf32>
      %52 = arith.mulf %51, %48 : vector<32x32xf32>
      %53 = arith.select %50, %48, %52 : vector<32x32xi1>, vector<32x32xf32>
      %c0_i8 = arith.constant 0 : i8
      %54 = vector.broadcast %c0_i8 : i8 to vector<32x32xi8>
      %55 = arith.cmpi ne, %42, %54 : vector<32x32xi8>
      %cst_30 = arith.constant -1.000000e+30 : f32
      %56 = vector.broadcast %cst_30 : f32 to vector<32x32xf32>
      %57 = arith.select %55, %53, %56 : vector<32x32xi1>, vector<32x32xf32>
      %cst_31 = arith.constant dense<0xFF800000> : vector<32xf32>
      %58 = vector.multi_reduction <maximumf>, %57, %cst_31 [1] : vector<32x32xf32> to vector<32xf32>
      %59 = vector.shape_cast %58 : vector<32xf32> to vector<32x1xf32>
      %60 = vector.broadcast %59 : vector<32x1xf32> to vector<32x32xf32>
      %61 = arith.subf %57, %60 : vector<32x32xf32>
      %62 = math.exp %61 : vector<32x32xf32>
      %cst_32 = arith.constant 0.000000e+00 : f32
      %63 = vector.broadcast %cst_32 : f32 to vector<32x32xf32>
      %64 = arith.select %55, %62, %63 : vector<32x32xi1>, vector<32x32xf32>
      %cst_33 = arith.constant dense<0.000000e+00> : vector<32xf32>
      %65 = vector.multi_reduction <add>, %64, %cst_33 [1] : vector<32x32xf32> to vector<32xf32>
      %66 = vector.shape_cast %65 : vector<32xf32> to vector<32x1xf32>
      %cst_34 = arith.constant 0.000000e+00 : f32
      %67 = vector.broadcast %cst_34 : f32 to vector<32x1xf32>
      %68 = arith.cmpf ogt, %66, %67 : vector<32x1xf32>
      %cst_35 = arith.constant 1.000000e+00 : f32
      %69 = vector.broadcast %cst_35 : f32 to vector<32x1xf32>
      %70 = arith.select %68, %66, %69 : vector<32x1xi1>, vector<32x1xf32>
      %71 = tpu.reciprocal %70 {approx = true} : vector<32x1xf32> -> vector<32x1xf32>
      %72 = arith.mulf %70, %71 : vector<32x1xf32>
      %cst_36 = arith.constant 2.000000e+00 : f32
      %73 = vector.broadcast %cst_36 : f32 to vector<32x1xf32>
      %74 = arith.subf %73, %72 : vector<32x1xf32>
      %75 = arith.mulf %71, %74 : vector<32x1xf32>
      %76 = vector.broadcast %75 : vector<32x1xf32> to vector<32x32xf32>
      %77 = arith.mulf %64, %76 : vector<32x32xf32>
      %cst_37 = arith.constant dense<0.000000e+00> : vector<32x128xf32>
      %78 = tpu.matmul %77, %18, %cst_37 {dimension_numbers = #tpu.dot_dimension_numbers<[1], [0], [0], [1], [0, 0, 1, 1], [], []>} : vector<32x32xf32>, vector<32x128xf32>, vector<32x128xf32> -> vector<32x128xf32>
      %79 = math.tanh %78 : vector<32x128xf32>
      %80 = arith.addf %41, %79 : vector<32x128xf32>
      %c0_38 = arith.constant 0 : index
      %c0_39 = arith.constant 0 : index
      %81 = vector.load %arg11[%c0_38, %c0_39] : memref<32x128xf32, #tpu.memory_space<vmem>>, vector<32x128xf32>
      tpu.vector_store %arg11[%c0_38, %c0_39], %80 {strides = array<i32>} : memref<32x128xf32, #tpu.memory_space<vmem>>, vector<32x128xf32>,
    } else {
    }
    %c0_16 = arith.constant 0 : index
    %c0_17 = arith.constant 0 : index
    %31 = vector.load %arg11[%c0_16, %c0_17] : memref<32x128xf32, #tpu.memory_space<vmem>>, vector<32x128xf32>
    %c0_18 = arith.constant 0 : index
    %c0_19 = arith.constant 0 : index
    %c0_20 = arith.constant 0 : index
    %32 = vector.load %arg7[%c0_18, %c0_19, %c0_20] : memref<1x32x128xf32, #tpu.memory_space<vmem>>, vector<1x32x128xf32>
    %33 = vector.shape_cast %32 : vector<1x32x128xf32> to vector<32x128xf32>
    %34 = vector.shape_cast %31 : vector<32x128xf32> to vector<1x32x128xf32>
    tpu.vector_store %arg7[%c0_18, %c0_19, %c0_20], %34 {strides = array<i32>} : memref<1x32x128xf32, #tpu.memory_space<vmem>>, vector<1x32x128xf32>,
    return
  }
  func.func @transform_0(%arg0: i32, %arg1: memref<2x4xi32, #tpu.memory_space<smem>>) -> (i32, i32, i32) {
    %c0_i32 = arith.constant 0 : i32
    %c0_i32_0 = arith.constant 0 : i32
    %c0_i32_1 = arith.constant 0 : i32
    return %arg0, %c0_i32, %c0_i32_0 : i32, i32, i32
  }
  func.func @transform_1(%arg0: i32, %arg1: memref<2x4xi32, #tpu.memory_space<smem>>) -> (i32, i32, i32) {
    %c0_i32 = arith.constant 0 : i32
    %c0_i32_0 = arith.constant 0 : i32
    %c0_i32_1 = arith.constant 0 : i32
    return %arg0, %c0_i32, %c0_i32_0 : i32, i32, i32
  }
  func.func @transform_4(%arg0: i32, %arg1: memref<2x4xi32, #tpu.memory_space<smem>>) -> (i32, i32, i32) {
    %c0_i32 = arith.constant 0 : i32
    %c0_i32_0 = arith.constant 0 : i32
    %c0_i32_1 = arith.constant 0 : i32
    return %arg0, %c0_i32, %c0_i32_0 : i32, i32, i32
  }
  func.func @transform_5(%arg0: i32, %arg1: memref<2x4xi32, #tpu.memory_space<smem>>) -> (i32, i32, i32) {
    %c0_i32 = arith.constant 0 : i32
    %c0_i32_0 = arith.constant 0 : i32
    %c0_i32_1 = arith.constant 0 : i32
    return %arg0, %c0_i32, %c0_i32_0 : i32, i32, i32
  }
}

</mosaic_0001>

<bundles_post_ra>
// kernel: tpu_custom_call.1
= control target key start
LH: loop header
LB: loop body
LE: loop exit
PB: predicated region body
PF: predicated region fallthrough
CT: control target
= control target key end

     0   :  { %s1548_s24 = smov [#allocation7]   ;;  %s1948_s0 = inlined_call_operand.vmem [shape: s32[2,4], index: 0, kind: input, shape index: {}]   ;;  %s1949_s1 = inlined_call_operand.vmem [shape: f32[2,32,16], index: 1, kind: input, shape index: {}]   ;;  %s1950_s2 = inlined_call_operand.vmem [shape: f32[2,32,32], index: 2, kind: input, shape index: {}]   ;;  %s1951_s3 = inlined_call_operand.vmem [shape: s8[2,32,32], index: 3, kind: input, shape index: {}]   ;;  %s1952_s4 = inlined_call_operand.vmem [shape: s8[1,32,32], index: 4, kind: input, shape index: {}]   ;;  %s1953_s5 = inlined_call_operand.hbm [shape: f32[2,16,640], index: 5, kind: input, shape index: {}]   ;;  %s1954_s6 = inlined_call_operand.hbm [shape: f32[2,32,128], index: 6, kind: output, shape index: {}]  }
   0x1   :  { %1956 = sst [smem:[#allocation21_spill]] %s1953_s5  ;;  %s12_s23 = sshll.u32 %s1948_s0, 4  ;;  %s13_s23 = int_to_ptr.vmem [resolvable:$true] %s12_s23 }
   0x2   :  { %15 = dma.vmem_to_smem %s13_s23, 32, %s1548_s24, [#allocation6] }
   0x3   :  { %1518 = dma.done.wait [#allocation6], 32 }
   0x4   :  { %1519 = vsyncadd [#allocation6], 4294967264 }
   0x5   :  { %18 = sfence }
   0x6   :  { %19 = vsyncpa [#allocation9], 0 }
   0x7   :  { %21 = vsyncpa [#allocation9 + $0x1], 0 }
   0x8   :  { %22 = vsyncpa [#allocation10], 0 }
   0x9   :  { %24 = vsyncpa [#allocation10 + $0x1], 0  ;;  %s1596_s25 = smov 0   ;;  %s1598_s26 = smov 0  }
   0xa   :  { %s1600_s27 = smov 0   ;;  %s1602_s28 = smov 0  }
   0xb LB: > { %1957 = sst [smem:[#allocation19_spill]] %s1542_s27  ;;  %s1617_s0 = sadd.s32 4294967295, %s1546_s28   ;;  %s1546_s28 = sphi %s1602_s28, %s1985_s28   ;;  %s1542_s27 = sphi %s1600_s27, %s1984_s27   ;;  %s1538_s26 = sphi %s1598_s26, %s1983_s26   ;;  %s1534_s25 = sphi %s1596_s25, %s1982_s25  }
   0xc   : > { %s1214_s29 = sadd.s32 4294967294, %s1546_s28   ;;  %s1621_s30 = sadd.s32 1, %s1546_s28  }
   0xd   : > { %s89_s7 = sadd.s32 1, %s1542_s27  ;;  %s86_s8 = ssub.s32 %s1546_s28, %s1621_s30 }
   0xe   : > { %p96_p0 = scmp.ne.s32.totalorder %s1542_s27, %s1538_s26  ;;  %p87_p1 = scmp.eq.s32.totalorder %s86_s8, 0 }
   0xf   : > { %p97_p2 = scmp.eq.s32.totalorder %s1546_s28, 0  ;;  %p102_p3 = scmp.ne.s32.totalorder %s1538_s26, %s1534_s25 }
  0x10   : > { %p103_p4 = scmp.eq.s32.totalorder %s1617_s0, 0  ;;  %p126_p7 = scmp.eq.s32.totalorder %s1617_s0, 1 }
  0x11   : > { %s1633_s9 = scalar_select %p87_p1, %s1542_s27, %s89_s7  }
  0x12   : > { %p98_p5 = por %p97_p2, %p96_p0  ;;  %p1635_p6 = por %p103_p4, %p102_p3 }
  0x13   : > { %1958 = sst [smem:[#allocation20_spill]] %s1633_s9  ;;  %p132_p8 = scmp.eq.s32.totalorder %s1214_s29, 1 }
  0x14   : > { %p1216_p9 = scmp.ge.s32.totalorder %s1546_s28, 2  ;;  %p1316_p10 = scmp.lt.s32.totalorder %s1546_s28, 2 }
  0x15   : > { %p1642_p11 = por %p126_p7, %p96_p0  ;;  %p1646_p12 = por %p132_p8, %p102_p3 }
  0x16   : > { %s168_s13 = sand.u32 1, %s1542_s27   ;;  %s1302_s14 = smul.u32 80, %s1546_s28 }
  0x17   : > { %s1301_s15 = smul.u32 80, %s168_s13  ;;  %s1962_s5 = sld [smem:[#allocation21_spill]] }
  0x18   : > { %p1655_p13 = pnand %p1316_p10, %p98_p5  ;;  %s169_s23 = scalar_lea.sflag [#allocation9], %s168_s13 }
  0x19   : > { %s172_s21 = scalar_lea.vmem [#allocation8], %s1301_s15 }
  0x1a   : > { %s180_s22 = sshll.u32 %s172_s21, 4  ;;  %p1448_p1 = pneg %p1655_p13  ;;  %s181_s22 = int_to_ptr.vmem [resolvable:$true] %s180_s22 }
  0x1d   : > { %s177_s18 = scalar_lea.hbm %s1962_s5, %s1302_s14  ;;  %s1451_s14 = scalar_lea.hbm %s1962_s5, 160 }
  0x1e   : > { %s178_s20 = sshll.u32 %s177_s18, 4  ;;  %s179_s20 = int_to_ptr.hbm [resolvable:$true] %s178_s20 }
  0x1f   : > { %s1444_s24 = sshra.s32 %s179_s20, 4  ;;  %s1445_s24 = int_to_ptr.hbm [resolvable:$true] %s1444_s24 }
  0x20   : > { %s1446_s29 = scalar_lea.hbm %s1445_s24, 80  ;;  %p1452_p4 = scmp.lt.s32.totalorder %s1445_s24, %s1962_s5 }
  0x21   : > { %p1447_p0 = scmp.ne.s32.totalorder %s1445_s24, %s1446_s29  ;;  %p1453_p5 = scmp.lt.s32.totalorder %s1451_s14, %s1446_s29 }
  0x23   : > { %p1449_p2 = pnand %p1448_p1, %p1447_p0  ;;  %p1454_p7 = por %p1453_p5, %p1452_p4 }
  0x25   : > { %p1450_p3 = pneg %p1449_p2 }
  0x27   : > { %p1455_p8 = pnand %p1454_p7, %p1450_p3 }
  0x29   : > { %1458 = shalt.err (!%p1455_p8)
}
  0x2a   : > { %s1549_s13 = smov 640   ;;  %s1550_s15 = smov 40  }
  0x2b   : > { %1311 = dma.hbm_to_vmem [thread:$0]  (!%p1655_p13), %s179_s20, 1280, %s181_s22, %s169_s23, %s1549_s13, %s1549_s13, %s1550_s15  }
  0x2c   : > { %p1218_p10 = scmp.ge.s32.totalorder %s1546_s28, 1  ;;  %p188_p0 = scmp.lt.s32.totalorder %s1546_s28, 3 }
  0x2e   : > { %p189_p1 = pnand %p1218_p10, %p188_p0 }
  0x2f   : > { %s1672_s18 = sand.u32 (!%p189_p1), 1, %s1538_s26  }
  0x30   : > { %192 = sbr.rel (%p189_p1) target bundleno = 1796 (0x704), region = 32  ;;  %s195_s24 = scalar_lea.sflag (!%p189_p1), [#allocation9], %s1672_s18 }
  0x31   : > { %s1303_s21 = smul.u32 (!%p189_p1), 80, %s1672_s18 }
  0x33   : > { %s1676_s29 = scalar_lea.vmem (!%p189_p1), [#allocation8], %s1303_s21 }
  0x35   : > { %1521 = dma.done.wait (%p1635_p6), %s195_s24, 1280  }
  0x36   : > { %1523 = vsyncadd (%p1635_p6), %s195_s24, 4294966016  ;;  %s1224_s19 = sshll.u32 %s1617_s0, 7  ;;  %s1219_s20 = sshll.u32 %s1672_s18, 5 }
  0x37   : > { %s1684_s22 = sld [smem:[#allocation7 + %s1224_s19]]  ;;  %s247_s23 = sadd.s32 1, %s1224_s19 }
  0x38   : > { %s1686_s7 = sld [smem:[#allocation7 + %s247_s23]]  ;;  %p232_p13 = scmp.lt.s32.totalorder %s1617_s0, 1 }
  0x39   : > { %s1700_s24 = scalar_lea.vmem [#allocation11], %s1219_s20 }
  0x3a   : > { %s233_s8 = scalar_select %p232_p13, %s1617_s0, 1 }
  0x3c   : > { %s1270_s14 = sshll.u32 %s233_s8, 5 }
  0x3d   : > { %s1693_s13 = scalar_lea.vmem %s1949_s1, %s1270_s14  ;;  %s1698_s21 = scalar_lea.vmem %s1950_s2, %s1270_s14 }
  0x3e   : > { %p1225_p6 = scmp.ne.s32.totalorder %s1684_s22, 1 }
  0x3f   : > { %s253_s23 = sadd.s32 (!%p1225_p6), 2, %s1224_s19 }
  0x40   : > { %252 = sbr.rel (%p1225_p6) target bundleno = 75 (0x4b), region = 40  ;;  %s254_s5 = sld [smem:[#allocation7 + %s253_s23]] (!%p1225_p6) }
  0x46   : > { %s1226_s8 = sshll.u32 %s254_s5, 3 }
  0x47   : > { %s256_s16 = scalar_lea.vmem %s1951_s3, %s1226_s8 }
  0x48   : > { %v283_v0 = vld [vmem:[%s256_s16] sm:$0xff] }
  0x49   : > { %284 = vst [vmem:[#allocation2] sm:$0xff] %v283_v0 }
  0x4a   : > { %290 = vsyncadd [#allocation4], 128 }
  0x4b PF: > { %p1227_p2 = scmp.ne.s32.totalorder %s1686_s7, 1 }
  0x4c   : > { %s294_s20 = sadd.s32 (!%p1227_p2), 3, %s1224_s19 }
  0x4d   : > { %293 = sbr.rel (%p1227_p2) target bundleno = 88 (0x58), region = 78  ;;  %s295_s14 = sld [smem:[#allocation7 + %s294_s20]] (!%p1227_p2) }
  0x53   : > { %s1228_s17 = sshll.u32 %s295_s14, 3 }
  0x54   : > { %s297_s5 = scalar_lea.vmem %s1952_s4, %s1228_s17 }
  0x55   : > { %v325_v1 = vld [vmem:[%s297_s5] sm:$0xff] }
  0x56   : > { %326 = vst [vmem:[#allocation3] sm:$0xff] %v325_v1 }
  0x57   : > { %332 = vsyncadd [#allocation4 + $0x1], 128 }
  0x58 PF: > { %v343_v2 = vld [vmem:[%s1676_s29 + $0x30] sm:$0xff]  ;;  %v338_v3 = vld [vmem:[%s1676_s29 + $0x8] sm:$0xff]  ;;  %vm347_vm0 = vcmask 130048   ;;  %v337_v9 = vld [vmem:[%s1676_s29] sm:$0xff]  ;;  %vm513_vm1 = vcmask 261120  }
  0x59   : > { %1275 = vmatpush.msra.mxu3 %v343_v2  ;;  %v335_v4 = vld [vmem:[%s1693_s13 + $0x10] sm:$0xff]  ;;  %403 = vmatpush.msra.mxu1 %v343_v2  ;;  %v333_v5 = vld [vmem:[%s1693_s13] sm:$0xff]  ;;  %v336_v6 = vld [vmem:[%s1693_s13 + $0x18] sm:$0xff] }
  0x5a   : > { %v334_v7 = vld [vmem:[%s1693_s13 + $0x8] sm:$0xff]  ;;  %v345_v11 = vld [vmem:[%s1676_s29 + $0x40] sm:$0xff]  ;;  %v339_v13 = vld [vmem:[%s1676_s29 + $0x10] sm:$0xff] }
  0x5b   : > { %1276 = vmatpush.msra.mxu3 %v338_v3  ;;  %404 = vmatpush.msra.mxu1 %v338_v3  ;;  %v342_v8 = vld [vmem:[%s1676_s29 + $0x28] sm:$0xff]  ;;  %v344_v10 = vld [vmem:[%s1676_s29 + $0x38] sm:$0xff]  ;;  %v341_v15 = vld [vmem:[%s1676_s29 + $0x20] sm:$0xff] }
  0x5c   : > { %1235 = vmatmul.msk.f32.vlgmr.msra.gmra.mxu3 %vm347_vm0, %v335_v4  ;;  %1233 = vmatmul.msk.f32.vlgmr.msra.gmra.mxu1 %vm347_vm0, %v333_v5  ;;  %v346_v12 = vld [vmem:[%s1676_s29 + $0x48] sm:$0xff]  ;;  %v340_v14 = vld [vmem:[%s1676_s29 + $0x18] sm:$0xff]  ;;  %v509_v20 = vld [vmem:[%s1698_s21] sm:$0xff] }
  0x5d   : > { %1273 = vmatpush.msra.mxu2 %v342_v8  ;;  %374 = vmatpush.msra.mxu0 %v342_v8  ;;  %v510_v21 = vld [vmem:[%s1698_s21 + $0x8] sm:$0xff]  ;;  %v511_v22 = vld [vmem:[%s1698_s21 + $0x10] sm:$0xff]  ;;  %v512_v23 = vld [vmem:[%s1698_s21 + $0x18] sm:$0xff] }
  0x5e   : > { %461 = vmatpush.msrb.mxu3 %v345_v11 }
  0x5f   : > { %1274 = vmatpush.msra.mxu2 %v337_v9  ;;  %375 = vmatpush.msra.mxu0 %v337_v9 }
  0x60   : > { %1231 = vmatmul.msk.f32.vlgmr.msra.gmra.mxu2 %vm347_vm0, %v335_v4  ;;  %1229 = vmatmul.msk.f32.vlgmr.msra.gmra.mxu0 %vm347_vm0, %v333_v5 }
  0x61   : > { %432 = vmatpush.msrb.mxu2 %v344_v10  ;;  %490 = vmatpush.msrb.mxu0 %v346_v12 }
  0x62   : > { %462 = vmatpush.msrb.mxu3 %v340_v14 }
  0x63   : > { %433 = vmatpush.msrb.mxu2 %v339_v13  ;;  %491 = vmatpush.msrb.mxu0 %v341_v15 }
  0x64   : > { %1236 = vmatmul.msk.f32.gmra.mxu3 %vm347_vm0, %v336_v6  ;;  %1234 = vmatmul.msk.f32.gmra.mxu1 %vm347_vm0, %v334_v7 }
  0x68   : > { %1232 = vmatmul.msk.f32.gmra.mxu2 %vm347_vm0, %v336_v6  ;;  %1230 = vmatmul.msk.f32.gmra.mxu0 %vm347_vm0, %v334_v7 }
  0x6c   : > { %1241 = vmatmul.msk.f32.vlgmr.msrb.gmra.mxu3 %vm347_vm0, %v333_v5 }
  0x70   : > { %1237 = vmatmul.msk.f32.vlgmr.msrb.gmra.mxu2 %vm347_vm0, %v333_v5  ;;  %1245 = vmatmul.msk.f32.vlgmr.msrb.gmra.mxu0 %vm347_vm0, %v333_v5 }
  0x74   : > { %1242 = vmatmul.msk.f32.gmra.mxu3 %vm347_vm0, %v334_v7 }
  0x78   : > { %1238 = vmatmul.msk.f32.gmra.mxu2 %vm347_vm0, %v334_v7  ;;  %1246 = vmatmul.msk.f32.gmra.mxu0 %vm347_vm0, %v334_v7 }
  0x7c   : > { %1243 = vmatmul.msk.f32.gmra.mxu3 %vm347_vm0, %v335_v4 }
  0x80   : > { %1239 = vmatmul.msk.f32.gmra.mxu2 %vm347_vm0, %v335_v4  ;;  %1247 = vmatmul.msk.f32.gmra.mxu0 %vm347_vm0, %v335_v4 }
  0x84   : > { %1244 = vmatmul.msk.f32.gmra.mxu3 %vm347_vm0, %v336_v6 }
  0x88   : > { %1240 = vmatmul.msk.f32.gmra.mxu2 %vm347_vm0, %v336_v6  ;;  %1248 = vmatmul.msk.f32.gmra.mxu0 %vm347_vm0, %v336_v6 }
  0xd9   : > { %v406_v17 = vpop.f32.mrf.mxu1 }
  0xdd   : > { %v377_v24 = vpop.f32.mrf.mxu0 }
  0xde   : > { %1362 = vtanh.f32 %v377_v24 }
  0xdf   : > { %v412_v16 = vpop.f32.mrf.mxu3 }
  0xe1   : > { %v409_v19 = vpop.f32.mrf.mxu1 }
  0xe3   : > { %v383_v25 = vpop.f32.mrf.mxu2 }
  0xe4   : > { %v1363_v41 = vpop.eup %1362 }
  0xe5   : > { %v380_v26 = vpop.f32.mrf.mxu0 }
  0xe7   : > { %v415_v18 = vpop.f32.mrf.mxu3 }
  0xe8   : > { %538 = vmatpush.msrb.mxu1 %v415_v18 }
  0xea   : > { %539 = vmatpush.msrb.mxu1 %v412_v16 }
  0xeb   : > { %v386_v27 = vpop.f32.mrf.mxu2 }
  0xec   : > { %540 = vmatpush.msrb.mxu1 %v409_v19 }
  0xed   : > { %v1758_v29 = vpop.f32.mrf.mxu0 }
  0xee   : > { %541 = vmatpush.msrb.mxu1 %v406_v17 }
  0xef   : > { %1249 = vmatmul.msk.f32.vlgmr.msrb.gmra.mxu1 %vm513_vm1, %v509_v20  ;;  %v1756_v28 = vpop.f32.mrf.mxu3 }
  0xf3   : > { %v1760_v30 = vpop.f32.mrf.mxu2 }
  0xf5   : > { %v1764_v32 = vpop.f32.mrf.mxu0 }
  0xf7   : > { %1250 = vmatmul.msk.f32.gmra.mxu1 %vm513_vm1, %v510_v21  ;;  %v1762_v31 = vpop.f32.mrf.mxu3 }
  0xfb   : > { %v438_v33 = vpop.f32.mrf.mxu2 }
  0xfd   : > { %v1768_v35 = vpop.f32.mrf.mxu0 }
  0xff   : > { %1251 = vmatmul.msk.f32.gmra.mxu1 %vm513_vm1, %v511_v22  ;;  %v1766_v34 = vpop.f32.mrf.mxu3 }
 0x103   : > { %v441_v36 = vpop.f32.mrf.mxu2 }
 0x105   : > { %v1772_v39 = vpop.f32.mrf.mxu0 }
 0x107   : > { %1252 = vmatmul.msk.f32.gmra.mxu1 %vm513_vm1, %v512_v23  ;;  %v1770_v38 = vpop.f32.mrf.mxu3 }
 0x10b   : > { %v444_v40 = vpop.f32.mrf.mxu2 }
 0x16c   : > { %v543_v37 = vpop.f32.mrf.mxu1 }
 0x16d   : > { %1364 = vtanh.f32 %v543_v37 }
 0x16e   : > { %1366 = vtanh.f32 %v380_v26 }
 0x173   : > { %v1365_v42 = vpop.eup %1364 }
 0x174   : > { %v559_v43 = vadd.f32 %v1365_v42, %v1363_v41  ;;  %v546_v44 = vpop.f32.mrf.mxu1  ;;  %v1367_v45 = vpop.eup %1366 }
 0x175   : > { %1368 = vtanh.f32 %v546_v44 }
 0x176   : > { %563 = vst [vmem:[#allocation5 + $0x10] sm:$0xff] %v559_v43  ;;  %1370 = vtanh.f32 %v383_v25 }
 0x17b   : > { %v1369_v46 = vpop.eup %1368 }
 0x17c   : > { %v560_v47 = vadd.f32 %v1369_v46, %v1367_v45  ;;  %v549_v48 = vpop.f32.mrf.mxu1  ;;  %v1371_v49 = vpop.eup %1370 }
 0x17d   : > { %1372 = vtanh.f32 %v549_v48 }
 0x17e   : > { %564 = vst [vmem:[#allocation5] sm:$0xff] %v560_v47  ;;  %1374 = vtanh.f32 %v386_v27 }
 0x183   : > { %v1373_v50 = vpop.eup %1372 }
 0x184   : > { %v561_v51 = vadd.f32 %v1373_v50, %v1371_v49  ;;  %v552_v52 = vpop.f32.mrf.mxu1  ;;  %v1375_v53 = vpop.eup %1374 }
 0x185   : > { %1376 = vtanh.f32 %v552_v52 }
 0x186   : > { %565 = vst [vmem:[#allocation5 + $0x18] sm:$0xff] %v561_v51 }
 0x18a   : > { %569 = sbr.rel (%p1225_p6) target bundleno = 1087 (0x43f), region = 116 }
 0x18b   : > { %v1377_v54 = vpop.eup %1376 }
 0x18c   : > { %v562_v55 = vadd.f32 %v1377_v54, %v1375_v53 }
 0x18e   : > { %566 = vst [vmem:[#allocation5 + $0x8] sm:$0xff] %v562_v55 }
 0x18f   : > { %1524 = dma.done.wait [#allocation4], 128 }
 0x190   : > { %1525 = vsyncadd [#allocation4], 4294967168  ;;  %1278 = vmatpush.msra.mxu2 %v444_v40  ;;  %1279 = vmatpush.msra.mxu3 %v444_v40  ;;  %s1551_s27 = smov 127   ;;  %v1552_v56 = vmov 0   ;;  %v580_v61 = vld [vmem:[#allocation2] sm:$0xff] }
 0x191   : > { %585 = vrot.lane.b32.xlu0 %v1758_v29, %s1551_s27  ;;  %589 = vrot.lane.b32.xlu1 %v1768_v35, %s1551_s27  ;;  %vm662_vm2 = vnez %v580_v61 }
 0x192   : > { %1378 = vset.pattern.permute.xlu2 %v1552_v56  ;;  %1380 = vset.pattern.permute.xlu1 %v1552_v56  ;;  %v663_v62 = vsel %vm662_vm2, 16843009, %v1552_v56 }
 0x193   : > { %638 = vperm.xlu2 %1378, %v1768_v35   ;;  %1379 = vset.pattern.permute.xlu0 %v1552_v56  ;;  %v667_v0 = vunpack.c.3.s8 %v663_v62  ;;  %v666_v1 = vunpack.c.2.s8 %v663_v62  ;;  %v665_v4 = vunpack.c.1.s8 %v663_v62  ;;  %v664_v5 = vunpack.c.0.s8 %v663_v62 }
 0x194   : > { %1281 = vmatpush.msra.mxu2 %v441_v36  ;;  %1282 = vmatpush.msra.mxu3 %v441_v36 }
 0x195   : > { %788 = vmatpush.msra.mxu0 %v444_v40  ;;  %1277 = vmatpush.msra.mxu1 %v444_v40  ;;  %v674_v2 = vpack.c.b16 %v667_v0, %v667_v0  ;;  %v672_v3 = vpack.c.b16 %v666_v1, %v666_v1  ;;  %v670_v9 = vpack.c.b16 %v665_v4, %v665_v4 }
 0x196   : > { %1284 = vmatpush.msra.mxu2 %v438_v33  ;;  %1285 = vmatpush.msra.mxu3 %v438_v33  ;;  %v668_v10 = vpack.c.b16 %v664_v5, %v664_v5 }
 0x197   : > { %789 = vmatpush.msra.mxu0 %v441_v36  ;;  %1280 = vmatpush.msra.mxu1 %v441_v36  ;;  %v675_v7 = vpack.c.b8 %v674_v2, %v674_v2  ;;  %v673_v8 = vpack.c.b8 %v672_v3, %v672_v3  ;;  %v671_v11 = vpack.c.b8 %v670_v9, %v670_v9 }
 0x198   : > { %1287 = vmatpush.msra.mxu2 %v1760_v30  ;;  %1288 = vmatpush.msra.mxu3 %v1760_v30  ;;  %v669_v12 = vpack.c.b8 %v668_v10, %v668_v10 }
 0x199   : > { %587 = vrot.lane.b32.xlu0 %v1764_v32, %s1551_s27  ;;  %591 = vrot.lane.b32.xlu1 %v1772_v39, %s1551_s27  ;;  %vm679_vm3 = vnez %v675_v7  ;;  %vm678_vm4 = vnez %v673_v8  ;;  %vm677_vm5 = vnez %v671_v11 }
 0x19a   : > { %790 = vmatpush.msra.mxu0 %v438_v33  ;;  %1283 = vmatpush.msra.mxu1 %v438_v33  ;;  %v683_v13 = vsel %vm679_vm3, 16843009, %v1552_v56  ;;  %v682_v14 = vsel %vm678_vm4, 16843009, %v1552_v56  ;;  %vm676_vm6 = vnez %v669_v12  ;;  %v681_v25 = vsel %vm677_vm5, 16843009, %v1552_v56 }
 0x19b   : > { %642 = vperm.xlu2 %1378, %v1772_v39   ;;  %v687_v19 = vunpack.c.0.s8 %v683_v13  ;;  %v686_v20 = vunpack.c.0.s8 %v682_v14  ;;  %v680_v26 = vsel %vm676_vm6, 16843009, %v1552_v56  ;;  %v685_v37 = vunpack.c.0.s8 %v681_v25 }
 0x19c   : > { %791 = vmatpush.msra.mxu0 %v1760_v30  ;;  %1286 = vmatpush.msra.mxu1 %v1760_v30  ;;  %v684_v40 = vunpack.c.0.s8 %v680_v26 }
 0x19d   : > { %vm1796_vm9 = vcmp.ne.s32.totalorder %v687_v19, 0  ;;  %vm1800_vm10 = vcmp.ne.s32.totalorder %v686_v20, 0  ;;  %vm1810_vm13 = vcmp.ne.s32.totalorder %v685_v37, 0 }
 0x19e   : > { %vm1814_vm14 = vcmp.ne.s32.totalorder %v684_v40, 0 }
 0x1a1   : > { %634 = vperm.xlu1 %1380, %v1764_v32   ;;  %630 = vperm.xlu0 %1379, %v1758_v29  }
 0x1ed   : > { %v639_v63 = vpop.permute.xlu2 %638 }
 0x1f5   : > { %v643_v6 = vpop.permute.xlu2 %642 }
 0x203   : > { %v586_v57 = vpop.permute.xlu0 %585  ;;  %v590_v59 = vpop.permute.xlu1 %589 }
 0x204   : > { %597 = vxpose.xlu2.b32.start [1/4] (short) (narrow) %v586_v57, 8 }
 0x20b   : > { %v588_v58 = vpop.permute.xlu0 %587  ;;  %v592_v60 = vpop.permute.xlu1 %591 }
 0x20c   : > { %598 = vxpose.xlu2.b32.cont [2/4] (short) (narrow) %v588_v58, 8 }
 0x213   : > { %v635_v17 = vpop.permute.xlu1 %634  ;;  %v631_v18 = vpop.permute.xlu0 %630 }
 0x214   : > { %599 = vxpose.xlu2.b32.cont [3/4] (short) (narrow) %v590_v59, 8 }
 0x21c   : > { %600 = vxpose.xlu2.b32.end [4/4] (short) (narrow) %v592_v60, 8 }
 0x29d   : > { %v613_v15 = vpop.trf.xlu2 }
 0x29e   : > { %v645_v16 = vperm.slane %v613_v15, 0 }
 0x2a0   : > { %v649_v21 = vadd.f32 %v645_v16, %v643_v6  ;;  %v648_v22 = vadd.f32 %v645_v16, %v639_v63  ;;  %v647_v23 = vadd.f32 %v645_v16, %v635_v17  ;;  %v646_v24 = vadd.f32 %v645_v16, %v631_v18 }
 0x2a2   : > { %vm653_vm7 = vcmp.ge.f32.partialorder %v649_v21, 0.0  ;;  %vm652_vm8 = vcmp.ge.f32.partialorder %v648_v22, 0.0  ;;  %v657_v27 = vmul.f32 0.01, %v649_v21  ;;  %v656_v33 = vmul.f32 0.01, %v648_v22 }
 0x2a3   : > { %v655_v41 = vmul.f32 0.01, %v647_v23  ;;  %v654_v42 = vmul.f32 0.01, %v646_v24  ;;  %vm651_vm11 = vcmp.ge.f32.partialorder %v647_v23, 0.0  ;;  %vm650_vm12 = vcmp.ge.f32.partialorder %v646_v24, 0.0 }
 0x2a4   : > { %v661_v43 = vsel %vm653_vm7, %v649_v21, %v657_v27  ;;  %v660_v44 = vsel %vm652_vm8, %v648_v22, %v656_v33 }
 0x2a5   : > { %v695_v45 = vsel %vm1796_vm9, %v661_v43, -1e+30  ;;  %v694_v46 = vsel %vm1800_vm10, %v660_v44, -1e+30  ;;  %v659_v49 = vsel %vm651_vm11, %v647_v23, %v655_v41  ;;  %v658_v51 = vsel %vm650_vm12, %v646_v24, %v654_v42 }
 0x2a6   : > { %v705_v47 = vsel %vm513_vm1, %v695_v45, -inf  ;;  %v702_v48 = vsel %vm513_vm1, %v694_v46, -inf  ;;  %v693_v53 = vsel %vm1810_vm13, %v659_v49, -1e+30  ;;  %v692_v54 = vsel %vm1814_vm14, %v658_v51, -1e+30 }
 0x2a7   : > { %706 = vmax.xlane.f32.xlu0 %v705_v47  ;;  %703 = vmax.xlane.f32.xlu1 %v702_v48  ;;  %v699_v55 = vsel %vm513_vm1, %v693_v53, -inf  ;;  %v696_v56 = vsel %vm513_vm1, %v692_v54, -inf }
 0x2af   : > { %700 = vmax.xlane.f32.xlu0 %v699_v55  ;;  %697 = vmax.xlane.f32.xlu1 %v696_v56 }
 0x31a   : > { %v707_v57 = vpop.xlane.xlu0 %706  ;;  %v704_v58 = vpop.xlane.xlu1 %703 }
 0x31b   : > { %v711_v59 = vsub.f32 %v695_v45, %v707_v57  ;;  %v710_v60 = vsub.f32 %v694_v46, %v704_v58  ;;  %v579_v57 = vld [vmem:[#allocation5 + $0x8] sm:$0xff]  ;;  %v578_v58 = vld [vmem:[#allocation5 + $0x18] sm:$0xff] }
 0x31d   : > { %v718_v61 = vmul.f32 1.442695, %v711_v59  ;;  %v716_v62 = vmul.f32 1.442695, %v710_v60 }
 0x31f   : > { %1381 = vpow2.f32 %v718_v61 }
 0x320   : > { %1383 = vpow2.f32 %v716_v62  ;;  %v576_v62 = vld [vmem:[#allocation5 + $0x10] sm:$0xff] }
 0x322   : > { %v701_v63 = vpop.xlane.xlu0 %700  ;;  %v698_v0 = vpop.xlane.xlu1 %697 }
 0x323   : > { %v709_v1 = vsub.f32 %v693_v53, %v701_v63  ;;  %v708_v2 = vsub.f32 %v692_v54, %v698_v0  ;;  %v577_v0 = vld [vmem:[#allocation5] sm:$0xff] }
 0x325   : > { %v1382_v3 = vpop.eup %1381  ;;  %v714_v4 = vmul.f32 1.442695, %v709_v1  ;;  %v712_v5 = vmul.f32 1.442695, %v708_v2 }
 0x326   : > { %v1384_v6 = vpop.eup %1383  ;;  %v723_v7 = vsel %vm1796_vm9, %v1382_v3, 0.0 }
 0x327   : > { %1385 = vpow2.f32 %v714_v4  ;;  %v733_v8 = vsel %vm513_vm1, %v723_v7, 0.0  ;;  %v722_v9 = vsel %vm1800_vm10, %v1384_v6, 0.0 }
 0x328   : > { %1387 = vpow2.f32 %v712_v5  ;;  %734 = vadd.xlane.f32.xlu2 %v733_v8  ;;  %v730_v10 = vsel %vm513_vm1, %v722_v9, 0.0 }
 0x329   : > { %731 = vadd.xlane.f32.xlu1 %v730_v10 }
 0x32d   : > { %v1386_v11 = vpop.eup %1385 }
 0x32e   : > { %v1388_v12 = vpop.eup %1387  ;;  %v721_v13 = vsel %vm1810_vm13, %v1386_v11, 0.0 }
 0x32f   : > { %v727_v14 = vsel %vm513_vm1, %v721_v13, 0.0  ;;  %v720_v15 = vsel %vm1814_vm14, %v1388_v12, 0.0 }
 0x330   : > { %v724_v16 = vsel %vm513_vm1, %v720_v15, 0.0 }
 0x331   : > { %728 = vadd.xlane.f32.xlu1 %v727_v14  ;;  %725 = vadd.xlane.f32.xlu0 %v724_v16 }
 0x39b   : > { %v735_v17 = vpop.xlane.xlu2 %734 }
 0x39c   : > { %vm739_vm15 = vcmp.gt.f32.partialorder %v735_v17, 0.0  ;;  %v732_v18 = vpop.xlane.xlu1 %731 }
 0x39d   : > { %v743_v19 = vsel %vm739_vm15, %v735_v17, 1.0  ;;  %vm738_vm0 = vcmp.gt.f32.partialorder %v732_v18, 0.0 }
 0x39e   : > { %1389 = vrcp.f32 %v743_v19  ;;  %v742_v20 = vsel %vm738_vm0, %v732_v18, 1.0 }
 0x39f   : > { %1391 = vrcp.f32 %v742_v20 }
 0x3a4   : > { %v1390_v21 = vpop.eup %1389  ;;  %v726_v22 = vpop.xlane.xlu0 %725 }
 0x3a5   : > { %v729_v23 = vpop.xlane.xlu1 %728  ;;  %v1392_v24 = vpop.eup %1391  ;;  %v751_v25 = vmul.f32 %v1390_v21, %v743_v19  ;;  %vm736_vm2 = vcmp.gt.f32.partialorder %v726_v22, 0.0 }
 0x3a6   : > { %vm737_vm3 = vcmp.gt.f32.partialorder %v729_v23, 0.0  ;;  %v750_v26 = vmul.f32 %v1392_v24, %v742_v20  ;;  %v740_v27 = vsel %vm736_vm2, %v726_v22, 1.0 }
 0x3a7   : > { %v741_v30 = vsel %vm737_vm3, %v729_v23, 1.0  ;;  %v755_v33 = vsub.f32 2.0, %v751_v25  ;;  %1393 = vrcp.f32 %v740_v27 }
 0x3a8   : > { %v754_v36 = vsub.f32 2.0, %v750_v26  ;;  %1395 = vrcp.f32 %v741_v30 }
 0x3a9   : > { %v759_v37 = vmul.f32 %v1390_v21, %v755_v33 }
 0x3aa   : > { %v758_v40 = vmul.f32 %v1392_v24, %v754_v36 }
 0x3ab   : > { %v763_v41 = vmul.f32 %v759_v37, %v723_v7 }
 0x3ac   : > { %v762_v42 = vmul.f32 %v758_v40, %v722_v9 }
 0x3ad   : > { %v1394_v43 = vpop.eup %1393  ;;  %1257 = vmatmul.msk.f32.vlgmr.msra.gmra.mxu3 %vm513_vm1, %v763_v41 }
 0x3ae   : > { %v1396_v44 = vpop.eup %1395  ;;  %v748_v45 = vmul.f32 %v1394_v43, %v740_v27  ;;  %1256 = vmatmul.msk.f32.vlgmr.msra.gmra.mxu2 %vm513_vm1, %v762_v42 }
 0x3af   : > { %v749_v46 = vmul.f32 %v1396_v44, %v741_v30 }
 0x3b0   : > { %v752_v47 = vsub.f32 2.0, %v748_v45 }
 0x3b1   : > { %v753_v48 = vsub.f32 2.0, %v749_v46 }
 0x3b2   : > { %v756_v49 = vmul.f32 %v1394_v43, %v752_v47 }
 0x3b3   : > { %v757_v50 = vmul.f32 %v1396_v44, %v753_v48 }
 0x3b4   : > { %v760_v51 = vmul.f32 %v756_v49, %v720_v15 }
 0x3b5   : > { %v761_v52 = vmul.f32 %v757_v50, %v721_v13 }
 0x3b6   : > { %1254 = vmatmul.msk.f32.vlgmr.msra.gmra.mxu0 %vm513_vm1, %v760_v51 }
 0x3b7   : > { %1255 = vmatmul.msk.f32.vlgmr.msra.gmra.mxu1 %vm513_vm1, %v761_v52 }
 0x430   : > { %v802_v53 = vpop.f32.mrf.mxu3 }
 0x431   : > { %v799_v54 = vpop.f32.mrf.mxu2  ;;  %1397 = vtanh.f32 %v802_v53 }
 0x432   : > { %1399 = vtanh.f32 %v799_v54 }
 0x433   : > { %v793_v55 = vpop.f32.mrf.mxu0 }
 0x434   : > { %1401 = vtanh.f32 %v793_v55  ;;  %v796_v56 = vpop.f32.mrf.mxu1 }
 0x435   : > { %1403 = vtanh.f32 %v796_v56 }
 0x437   : > { %v1398_v59 = vpop.eup %1397 }
 0x438   : > { %v1400_v60 = vpop.eup %1399  ;;  %v812_v61 = vadd.f32 %v1398_v59, %v579_v57 }
 0x439   : > { %v811_v63 = vadd.f32 %v1400_v60, %v578_v58 }
 0x43a   : > { %v1402_v1 = vpop.eup %1401  ;;  %816 = vst [vmem:[#allocation5 + $0x8] sm:$0xff] %v812_v61 }
 0x43b   : > { %v1404_v2 = vpop.eup %1403  ;;  %815 = vst [vmem:[#allocation5 + $0x18] sm:$0xff] %v811_v63  ;;  %v809_v3 = vadd.f32 %v1402_v1, %v576_v62 }
 0x43c   : > { %v810_v4 = vadd.f32 %v1404_v2, %v577_v0 }
 0x43d   : > { %813 = vst [vmem:[#allocation5 + $0x10] sm:$0xff] %v809_v3 }
 0x43e   : > { %814 = vst [vmem:[#allocation5] sm:$0xff] %v810_v4 }
 0x43f PF: > { %819 = sbr.rel (%p1227_p2) target bundleno = 1780 (0x6f4), region = 120 }
 0x444   : > { %1526 = dma.done.wait [#allocation4 + $0x1], 128 }
 0x445   : > { %1527 = vsyncadd [#allocation4 + $0x1], 4294967168  ;;  %1290 = vmatpush.msra.mxu2 %v1770_v38  ;;  %1291 = vmatpush.msra.mxu3 %v1770_v38  ;;  %s1553_s9 = smov 125   ;;  %v1554_v5 = vmov 2   ;;  %v831_v7 = vld [vmem:[#allocation3] sm:$0xff] }
 0x446   : > { %836 = vrot.lane.b32.xlu0 %v1758_v29, %s1553_s9  ;;  %840 = vrot.lane.b32.xlu1 %v1768_v35, %s1553_s9  ;;  %vm913_vm4 = vnez %v831_v7  ;;  %v829_v56 = vld [vmem:[#allocation5 + $0x18] sm:$0xff] }
 0x447   : > { %1405 = vset.pattern.permute.xlu2 %v1554_v5  ;;  %1407 = vset.pattern.permute.xlu1 %v1554_v5 }
 0x448   : > { %889 = vperm.xlu2 %1405, %v1768_v35   ;;  %1406 = vset.pattern.permute.xlu0 %v1554_v5 }
 0x449   : > { %1293 = vmatpush.msra.mxu2 %v1766_v34  ;;  %1294 = vmatpush.msra.mxu3 %v1766_v34 }
 0x44a   : > { %1039 = vmatpush.msra.mxu0 %v1770_v38  ;;  %1289 = vmatpush.msra.mxu1 %v1770_v38 }
 0x44b   : > { %1296 = vmatpush.msra.mxu2 %v1762_v31  ;;  %1297 = vmatpush.msra.mxu3 %v1762_v31 }
 0x44c   : > { %1040 = vmatpush.msra.mxu0 %v1766_v34  ;;  %1292 = vmatpush.msra.mxu1 %v1766_v34 }
 0x44d   : > { %1299 = vmatpush.msra.mxu2 %v1756_v28  ;;  %1300 = vmatpush.msra.mxu3 %v1756_v28 }
 0x44e   : > { %838 = vrot.lane.b32.xlu0 %v1764_v32, %s1553_s9  ;;  %842 = vrot.lane.b32.xlu1 %v1772_v39, %s1553_s9 }
 0x44f   : > { %1041 = vmatpush.msra.mxu0 %v1762_v31  ;;  %1295 = vmatpush.msra.mxu1 %v1762_v31  ;;  %v1555_v31 = vmov 0  }
 0x450   : > { %893 = vperm.xlu2 %1405, %v1772_v39   ;;  %v914_v39 = vsel %vm913_vm4, 16843009, %v1555_v31 }
 0x451   : > { %1042 = vmatpush.msra.mxu0 %v1756_v28  ;;  %1298 = vmatpush.msra.mxu1 %v1756_v28  ;;  %v918_v9 = vunpack.c.3.s8 %v914_v39  ;;  %v917_v10 = vunpack.c.2.s8 %v914_v39  ;;  %v915_v12 = vunpack.c.0.s8 %v914_v39 }
 0x453   : > { %v925_v28 = vpack.c.b16 %v918_v9, %v918_v9  ;;  %v923_v11 = vpack.c.b16 %v917_v10, %v917_v10  ;;  %v919_v16 = vpack.c.b16 %v915_v12, %v915_v12 }
 0x455   : > { %v926_v13 = vpack.c.b8 %v925_v28, %v925_v28  ;;  %v924_v14 = vpack.c.b8 %v923_v11, %v923_v11  ;;  %v920_v18 = vpack.c.b8 %v919_v16, %v919_v16 }
 0x456   : > { %885 = vperm.xlu1 %1407, %v1764_v32   ;;  %881 = vperm.xlu0 %1406, %v1758_v29   ;;  %v916_v32 = vunpack.c.1.s8 %v914_v39 }
 0x457   : > { %vm930_vm5 = vnez %v926_v13  ;;  %vm929_vm6 = vnez %v924_v14  ;;  %vm927_vm8 = vnez %v920_v18 }
 0x458   : > { %v921_v15 = vpack.c.b16 %v916_v32, %v916_v32  ;;  %v934_v19 = vsel %vm930_vm5, 16843009, %v1555_v31  ;;  %v933_v20 = vsel %vm929_vm6, 16843009, %v1555_v31  ;;  %v931_v40 = vsel %vm927_vm8, 16843009, %v1555_v31 }
 0x459   : > { %v938_v25 = vunpack.c.0.s8 %v934_v19  ;;  %v937_v26 = vunpack.c.0.s8 %v933_v20  ;;  %v935_v46 = vunpack.c.0.s8 %v931_v40 }
 0x45a   : > { %v922_v17 = vpack.c.b8 %v921_v15, %v921_v15 }
 0x45b   : > { %vm1866_vm11 = vcmp.ne.s32.totalorder %v938_v25, 0  ;;  %vm1870_vm12 = vcmp.ne.s32.totalorder %v937_v26, 0  ;;  %vm1884_vm0 = vcmp.ne.s32.totalorder %v935_v46, 0 }
 0x45c   : > { %vm928_vm7 = vnez %v922_v17 }
 0x45d   : > { %v932_v37 = vsel %vm928_vm7, 16843009, %v1555_v31 }
 0x45e   : > { %v936_v45 = vunpack.c.0.s8 %v932_v37 }
 0x460   : > { %vm1880_vm15 = vcmp.ne.s32.totalorder %v936_v45, 0 }
 0x4a2   : > { %v890_v8 = vpop.permute.xlu2 %889 }
 0x4aa   : > { %v894_v29 = vpop.permute.xlu2 %893 }
 0x4b8   : > { %v837_v34 = vpop.permute.xlu0 %836  ;;  %v841_v38 = vpop.permute.xlu1 %840 }
 0x4b9   : > { %848 = vxpose.xlu2.b32.start [1/4] (short) (narrow) %v837_v34, 8 }
 0x4c0   : > { %v839_v35 = vpop.permute.xlu0 %838  ;;  %v843_v6 = vpop.permute.xlu1 %842 }
 0x4c1   : > { %849 = vxpose.xlu2.b32.cont [2/4] (short) (narrow) %v839_v35, 8 }
 0x4c8   : > { %v886_v23 = vpop.permute.xlu1 %885  ;;  %v882_v24 = vpop.permute.xlu0 %881 }
 0x4c9   : > { %850 = vxpose.xlu2.b32.cont [3/4] (short) (narrow) %v841_v38, 8 }
 0x4d1   : > { %851 = vxpose.xlu2.b32.end [4/4] (short) (narrow) %v843_v6, 8 }
 0x552   : > { %v864_v21 = vpop.trf.xlu2 }
 0x553   : > { %v896_v22 = vperm.slane %v864_v21, 0 }
 0x555   : > { %v900_v27 = vadd.f32 %v896_v22, %v894_v29  ;;  %v899_v30 = vadd.f32 %v896_v22, %v890_v8  ;;  %v898_v33 = vadd.f32 %v896_v22, %v886_v23  ;;  %v897_v36 = vadd.f32 %v896_v22, %v882_v24 }
 0x557   : > { %vm904_vm9 = vcmp.ge.f32.partialorder %v900_v27, 0.0  ;;  %vm903_vm10 = vcmp.ge.f32.partialorder %v899_v30, 0.0  ;;  %v908_v41 = vmul.f32 0.01, %v900_v27  ;;  %v907_v43 = vmul.f32 0.01, %v899_v30 }
 0x558   : > { %v906_v47 = vmul.f32 0.01, %v898_v33  ;;  %v905_v48 = vmul.f32 0.01, %v897_v36  ;;  %vm902_vm13 = vcmp.ge.f32.partialorder %v898_v33, 0.0  ;;  %vm901_vm14 = vcmp.ge.f32.partialorder %v897_v36, 0.0 }
 0x559   : > { %v912_v49 = vsel %vm904_vm9, %v900_v27, %v908_v41  ;;  %v911_v50 = vsel %vm903_vm10, %v899_v30, %v907_v43 }
 0x55a   : > { %v946_v51 = vsel %vm1866_vm11, %v912_v49, -1e+30  ;;  %v945_v52 = vsel %vm1870_vm12, %v911_v50, -1e+30  ;;  %v910_v55 = vsel %vm902_vm13, %v898_v33, %v906_v47  ;;  %v909_v57 = vsel %vm901_vm14, %v897_v36, %v905_v48 }
 0x55b   : > { %v956_v53 = vsel %vm513_vm1, %v946_v51, -inf  ;;  %v953_v54 = vsel %vm513_vm1, %v945_v52, -inf  ;;  %v944_v59 = vsel %vm1880_vm15, %v910_v55, -1e+30  ;;  %v943_v60 = vsel %vm1884_vm0, %v909_v57, -1e+30 }
 0x55c   : > { %957 = vmax.xlane.f32.xlu0 %v956_v53  ;;  %954 = vmax.xlane.f32.xlu1 %v953_v54  ;;  %v950_v61 = vsel %vm513_vm1, %v944_v59, -inf  ;;  %v947_v62 = vsel %vm513_vm1, %v943_v60, -inf  ;;  %v830_v55 = vld [vmem:[#allocation5 + $0x8] sm:$0xff] }
 0x564   : > { %951 = vmax.xlane.f32.xlu0 %v950_v61  ;;  %948 = vmax.xlane.f32.xlu1 %v947_v62  ;;  %v828_v62 = vld [vmem:[#allocation5] sm:$0xff] }
 0x5cf   : > { %v958_v63 = vpop.xlane.xlu0 %957  ;;  %v955_v0 = vpop.xlane.xlu1 %954 }
 0x5d0   : > { %v962_v1 = vsub.f32 %v946_v51, %v958_v63  ;;  %v961_v2 = vsub.f32 %v945_v52, %v955_v0 }
 0x5d2   : > { %v969_v3 = vmul.f32 1.442695, %v962_v1  ;;  %v967_v4 = vmul.f32 1.442695, %v961_v2 }
 0x5d4   : > { %1408 = vpow2.f32 %v969_v3 }
 0x5d5   : > { %1410 = vpow2.f32 %v967_v4 }
 0x5d7   : > { %v952_v5 = vpop.xlane.xlu0 %951  ;;  %v949_v34 = vpop.xlane.xlu1 %948 }
 0x5d8   : > { %v960_v35 = vsub.f32 %v944_v59, %v952_v5  ;;  %v959_v38 = vsub.f32 %v943_v60, %v949_v34  ;;  %v827_v60 = vld [vmem:[#allocation5 + $0x10] sm:$0xff] }
 0x5da   : > { %v1409_v6 = vpop.eup %1408  ;;  %v965_v7 = vmul.f32 1.442695, %v960_v35  ;;  %v963_v31 = vmul.f32 1.442695, %v959_v38 }
 0x5db   : > { %v1411_v39 = vpop.eup %1410  ;;  %v974_v8 = vsel %vm1866_vm11, %v1409_v6, 0.0 }
 0x5dc   : > { %1412 = vpow2.f32 %v965_v7  ;;  %v984_v9 = vsel %vm513_vm1, %v974_v8, 0.0  ;;  %v973_v10 = vsel %vm1870_vm12, %v1411_v39, 0.0 }
 0x5dd   : > { %1414 = vpow2.f32 %v963_v31  ;;  %985 = vadd.xlane.f32.xlu2 %v984_v9  ;;  %v981_v28 = vsel %vm513_vm1, %v973_v10, 0.0 }
 0x5de   : > { %982 = vadd.xlane.f32.xlu1 %v981_v28 }
 0x5e2   : > { %v1413_v11 = vpop.eup %1412 }
 0x5e3   : > { %v1415_v32 = vpop.eup %1414  ;;  %v972_v12 = vsel %vm1880_vm15, %v1413_v11, 0.0 }
 0x5e4   : > { %v978_v29 = vsel %vm513_vm1, %v972_v12, 0.0  ;;  %v971_v13 = vsel %vm1884_vm0, %v1415_v32, 0.0 }
 0x5e5   : > { %v975_v14 = vsel %vm513_vm1, %v971_v13, 0.0 }
 0x5e6   : > { %979 = vadd.xlane.f32.xlu1 %v978_v29  ;;  %976 = vadd.xlane.f32.xlu0 %v975_v14 }
 0x650   : > { %v986_v15 = vpop.xlane.xlu2 %985 }
 0x651   : > { %vm990_vm2 = vcmp.gt.f32.partialorder %v986_v15, 0.0  ;;  %v983_v16 = vpop.xlane.xlu1 %982 }
 0x652   : > { %v994_v17 = vsel %vm990_vm2, %v986_v15, 1.0  ;;  %vm989_vm3 = vcmp.gt.f32.partialorder %v983_v16, 0.0 }
 0x653   : > { %1416 = vrcp.f32 %v994_v17  ;;  %v993_v18 = vsel %vm989_vm3, %v983_v16, 1.0 }
 0x654   : > { %1418 = vrcp.f32 %v993_v18 }
 0x659   : > { %v1417_v19 = vpop.eup %1416  ;;  %v977_v20 = vpop.xlane.xlu0 %976 }
 0x65a   : > { %v980_v21 = vpop.xlane.xlu1 %979  ;;  %v1419_v22 = vpop.eup %1418  ;;  %v1002_v23 = vmul.f32 %v1417_v19, %v994_v17  ;;  %vm987_vm4 = vcmp.gt.f32.partialorder %v977_v20, 0.0 }
 0x65b   : > { %vm988_vm5 = vcmp.gt.f32.partialorder %v980_v21, 0.0  ;;  %v1001_v24 = vmul.f32 %v1419_v22, %v993_v18  ;;  %v991_v25 = vsel %vm987_vm4, %v977_v20, 1.0 }
 0x65c   : > { %v992_v26 = vsel %vm988_vm5, %v980_v21, 1.0  ;;  %v1006_v27 = vsub.f32 2.0, %v1002_v23  ;;  %1420 = vrcp.f32 %v991_v25 }
 0x65d   : > { %v1005_v30 = vsub.f32 2.0, %v1001_v24  ;;  %1422 = vrcp.f32 %v992_v26 }
 0x65e   : > { %v1010_v33 = vmul.f32 %v1417_v19, %v1006_v27 }
 0x65f   : > { %v1009_v36 = vmul.f32 %v1419_v22, %v1005_v30 }
 0x660   : > { %v1014_v37 = vmul.f32 %v1010_v33, %v974_v8 }
 0x661   : > { %v1013_v40 = vmul.f32 %v1009_v36, %v973_v10 }
 0x662   : > { %v1421_v41 = vpop.eup %1420  ;;  %1262 = vmatmul.msk.f32.vlgmr.msra.gmra.mxu3 %vm513_vm1, %v1014_v37 }
 0x663   : > { %v1423_v42 = vpop.eup %1422  ;;  %v999_v43 = vmul.f32 %v1421_v41, %v991_v25  ;;  %1261 = vmatmul.msk.f32.vlgmr.msra.gmra.mxu2 %vm513_vm1, %v1013_v40 }
 0x664   : > { %v1000_v44 = vmul.f32 %v1423_v42, %v992_v26 }
 0x665   : > { %v1003_v45 = vsub.f32 2.0, %v999_v43 }
 0x666   : > { %v1004_v46 = vsub.f32 2.0, %v1000_v44 }
 0x667   : > { %v1007_v47 = vmul.f32 %v1421_v41, %v1003_v45 }
 0x668   : > { %v1008_v48 = vmul.f32 %v1423_v42, %v1004_v46 }
 0x669   : > { %v1011_v49 = vmul.f32 %v1007_v47, %v971_v13 }
 0x66a   : > { %v1012_v50 = vmul.f32 %v1008_v48, %v972_v12 }
 0x66b   : > { %1259 = vmatmul.msk.f32.vlgmr.msra.gmra.mxu0 %vm513_vm1, %v1011_v49 }
 0x66c   : > { %1260 = vmatmul.msk.f32.vlgmr.msra.gmra.mxu1 %vm513_vm1, %v1012_v50 }
 0x6e5   : > { %v1053_v51 = vpop.f32.mrf.mxu3 }
 0x6e6   : > { %v1050_v52 = vpop.f32.mrf.mxu2  ;;  %1424 = vtanh.f32 %v1053_v51 }
 0x6e7   : > { %1426 = vtanh.f32 %v1050_v52 }
 0x6e8   : > { %v1044_v53 = vpop.f32.mrf.mxu0 }
 0x6e9   : > { %1428 = vtanh.f32 %v1044_v53  ;;  %v1047_v54 = vpop.f32.mrf.mxu1 }
 0x6ea   : > { %1430 = vtanh.f32 %v1047_v54 }
 0x6ec   : > { %v1425_v57 = vpop.eup %1424 }
 0x6ed   : > { %v1427_v58 = vpop.eup %1426  ;;  %v1063_v59 = vadd.f32 %v1425_v57, %v830_v55 }
 0x6ee   : > { %v1062_v61 = vadd.f32 %v1427_v58, %v829_v56 }
 0x6ef   : > { %v1429_v63 = vpop.eup %1428  ;;  %1067 = vst [vmem:[#allocation5 + $0x8] sm:$0xff] %v1063_v59 }
 0x6f0   : > { %v1431_v0 = vpop.eup %1430  ;;  %1066 = vst [vmem:[#allocation5 + $0x18] sm:$0xff] %v1062_v61  ;;  %v1060_v1 = vadd.f32 %v1429_v63, %v827_v60 }
 0x6f1   : > { %v1061_v2 = vadd.f32 %v1431_v0, %v828_v62 }
 0x6f2   : > { %1064 = vst [vmem:[#allocation5 + $0x10] sm:$0xff] %v1060_v1 }
 0x6f3   : > { %1065 = vst [vmem:[#allocation5] sm:$0xff] %v1061_v2 }
 0x6f4 PF: > { %s1272_s29 = sshll.u32 %s1617_s0, 5  ;;  %s1089_s13 = sshll.u32 %s1700_s24, 4  ;;  %s1090_s13 = int_to_ptr.vmem [resolvable:$true] %s1089_s13 }
 0x6f5   : > { %s1088_s7 = scalar_lea.hbm %s1954_s6, %s1272_s29  ;;  %s1077_s23 = scalar_lea.sflag [#allocation10], %s1672_s18 }
 0x6f6   : > { %v1071_v34 = vld [vmem:[#allocation5 + $0x8] sm:$0xff]  ;;  %s1091_s21 = sshll.u32 %s1088_s7, 4  ;;  %s1494_s14 = scalar_lea.hbm %s1954_s6, 64  ;;  %s1092_s21 = int_to_ptr.hbm [resolvable:$true] %s1091_s21 }
 0x6f7   : > { %v1070_v5 = vld [vmem:[#allocation5 + $0x18] sm:$0xff]  ;;  %1075 = vst [vmem:[%s1700_s24 + $0x18] sm:$0xff] %v1071_v34  ;;  %s1488_s8 = sshra.s32 %s1092_s21, 4  ;;  %s1489_s8 = int_to_ptr.hbm [resolvable:$true] %s1488_s8 }
 0x6f8   : > { %1074 = vst [vmem:[%s1700_s24 + $0x10] sm:$0xff] %v1070_v5  ;;  %s1490_s16 = scalar_lea.hbm %s1489_s8, 32  ;;  %p1495_p7 = scmp.lt.s32.totalorder %s1489_s8, %s1954_s6 }
 0x6f9   : > { %v1068_v3 = vld [vmem:[#allocation5 + $0x10] sm:$0xff]  ;;  %p1491_p3 = scmp.ne.s32.totalorder %s1489_s8, %s1490_s16  ;;  %p1496_p8 = scmp.lt.s32.totalorder %s1494_s14, %s1490_s16 }
 0x6fa   : > { %v1069_v4 = vld [vmem:[#allocation5] sm:$0xff]  ;;  %1072 = vst [vmem:[%s1700_s24] sm:$0xff] %v1068_v3 }
 0x6fb   : > { %1073 = vst [vmem:[%s1700_s24 + $0x8] sm:$0xff] %v1069_v4  ;;  %p1492_p4 = pnand %p1491_p3, %p1642_p11  ;;  %p1497_p10 = por %p1496_p8, %p1495_p7 }
 0x6fd   : > { %p1493_p5 = pneg %p1492_p4 }
 0x6ff   : > { %p1498_p0 = pnand %p1497_p10, %p1493_p5 }
 0x701   : > { %1501 = shalt.err (!%p1498_p0)
}
 0x702   : > { %s1556_s18 = smov 128   ;;  %s1557_s24 = smov 8  }
 0x703   : > { %1306 = dma.vmem_to_hbm [thread:$0]  (%p1642_p11), %s1090_s13, 512, %s1092_s21, %s1077_s23, %s1556_s18, %s1556_s18, %s1557_s24  }
 0x704 PF: > { %s1106_s15 = sand.u32 1, %s1534_s25   ;;  %p1313_p1 = pnand %p1216_p9, %p1646_p12 }
 0x705   : > { %s1107_s5 = scalar_lea.sflag [#allocation10], %s1106_s15 }
 0x706   : > { %p1314_p13 = pneg %p1313_p1 }
 0x708   : > { %1529 = dma.done.wait (%p1314_p13), %s1107_s5, 512  }
 0x709   : > { %1531 = vsyncadd (%p1314_p13), %s1107_s5, 4294966784  ;;  %s1980_s27 = sld [smem:[#allocation19_spill]]  ;;  %p27_p6 = scmp.ge.s32.totalorder %s1621_s30, 4  }
 0x70a   : > { %s1981_s9 = sld [smem:[#allocation20_spill]]  ;;  %s1982_s25 = smov %s1538_s26 }
 0x70b   : > { %s1985_s28 = smov %s1621_s30 }
 0x70c   :  { %29 = sbr.rel (!%p27_p6) target bundleno = 11 (0xb), region = 180 }
 0x70f   : > { %s1983_s26 = smov %s1980_s27 }
 0x710   : > { %s1984_s27 = smov %s1981_s9 }
 0x711   :  { %1113 = vsyncpa [#allocation9], 1 }
 0x712   :  { %1115 = vsyncpa [#allocation9 + $0x1], 1 }
 0x713   :  { %1116 = vsyncpa [#allocation10], 1 }
 0x714   :  { %1118 = vsyncpa [#allocation10 + $0x1], 1 }
 0x715   :  { %1119 = vsyncmov [#allocation4] }
 0x718   :  { %s1120_s28 = vpop.sfrf %1119 }
 0x719   :  { %p1268_p9 = scmp.ne.s32.totalorder %s1120_s28, 0 }
 0x71b   :  { %1124 = shalt.err (%p1268_p9)  }
 0x71c   :  { %1126 = vsyncmov [#allocation4 + $0x1] }
 0x71f   :  { %s1127_s11 = vpop.sfrf %1126 }
 0x720   :  { %p1269_p11 = scmp.ne.s32.totalorder %s1127_s11, 0 }
 0x722   :  { %1131 = shalt.err (%p1269_p11)  }

</bundles_post_ra>
